<compile_context>
chip_gen: v7x
topology: tpu7x:2x2x1
jax: 0.10.0
libtpu: 0.0.40
codegen_flags: <defaults>
</compile_context>

<pallas_src>
import functools

import jax
import jax.numpy as jnp
from jax.experimental import pallas as pl
from jax.experimental.pallas import tpu as pltpu

CLASS_NUM = 20
_LANES = 128
_SUBLANES = 8


def _yolo_loss_kernel(pred_ref, tgt_ref, out_ref, *, S, l_coord, l_noobj):
    """One block of cells.

    pred_ref / tgt_ref : (30, block_rows, 128)  channel-major, dense per channel
    out_ref            : (1, 8, 128) f32        per-block partial sum
                         (summed + /N outside the kernel).
    """
    f32 = jnp.float32

    def pch(k):  # predicted channel k as a dense (block_rows, 128) f32 tile
        return pred_ref[k].astype(f32)

    def tch(k):  # target channel k
        return tgt_ref[k].astype(f32)

    # ---- per-cell boxes (channels 0..9), confidences, object mask ----------
    px0, py0, pw0, ph0, pc0 = pch(0), pch(1), pch(2), pch(3), pch(4)
    px1, py1, pw1, ph1, pc1 = pch(5), pch(6), pch(7), pch(8), pch(9)
    tx0, ty0, tw0, th0, tc0 = tch(0), tch(1), tch(2), tch(3), tch(4)
    tx1, ty1, tw1, th1, tc1 = tch(5), tch(6), tch(7), tch(8), tch(9)

    coo = tc0 > 0.0  # cell contains an object

    # ---- IoU of each predicted box vs target box 0 (target corners hoisted) -
    inv_s = 1.0 / S
    t_cx, t_cy = tx0 * inv_s, ty0 * inv_s
    t_x1, t_y1 = t_cx - 0.5 * tw0, t_cy - 0.5 * th0
    t_x2, t_y2 = t_cx + 0.5 * tw0, t_cy + 0.5 * th0
    t_area = (t_x2 - t_x1) * (t_y2 - t_y1)

    def iou_vs_t0(px, py, pw, ph):
        p_cx, p_cy = px * inv_s, py * inv_s
        p_x1, p_y1 = p_cx - 0.5 * pw, p_cy - 0.5 * ph
        p_x2, p_y2 = p_cx + 0.5 * pw, p_cy + 0.5 * ph
        w = jnp.maximum(jnp.minimum(p_x2, t_x2) - jnp.maximum(p_x1, t_x1), 0.0)
        h = jnp.maximum(jnp.minimum(p_y2, t_y2) - jnp.maximum(p_y1, t_y1), 0.0)
        inter = w * h
        p_area = (p_x2 - p_x1) * (p_y2 - p_y1)
        denom = jnp.maximum(p_area + t_area - inter, 1e-12)  # no 0/0 on empty/padded cells
        return inter * pl.reciprocal(denom, approx=True)      # divide -> EUP slot

    iou0 = iou_vs_t0(px0, py0, pw0, ph0)
    iou1 = iou_vs_t0(px1, py1, pw1, ph1)
    resp1 = iou1 > iou0                     # ties -> box 0 (torch.max returns first index)
    max_iou = jnp.maximum(iou0, iou1)

    sel = lambda a1, a0: jnp.where(resp1, a1, a0)
    rpx, rpy = sel(px1, px0), sel(py1, py0)
    rpw, rph = sel(pw1, pw0), sel(ph1, ph0)
    rpc = sel(pc1, pc0)                     # responsible predicted confidence
    nrpc = jnp.where(resp1, pc0, pc1)       # non-responsible predicted confidence
    rtx, rty = sel(tx1, tx0), sel(ty1, ty0)
    rtw, rth = sel(tw1, tw0), sel(th1, th0)

    # ---- loss terms ---------------------------------------------------------
    contain = (rpc - max_iou) ** 2
    no_contain = nrpc ** 2                  # non-responsible conf target forced to 0
    loc = ((rpx - rtx) ** 2 + (rpy - rty) ** 2
           + (jnp.sqrt(rpw) - jnp.sqrt(rtw)) ** 2
           + (jnp.sqrt(rph) - jnp.sqrt(rth)) ** 2)
    noobj = (pc0 - tc0) ** 2 + (pc1 - tc1) ** 2

    cls = (pch(10) - tch(10)) ** 2          # unrolled dense VALU sum over 20 channels
    for k in range(11, 10 + CLASS_NUM):
        cls = cls + (pch(k) - tch(k)) ** 2

    # coo / noo contributions are mutually exclusive per cell -> single select
    # (the select also keeps any sqrt-NaN on object-free cells out of the sum).
    per_cell = jnp.where(
        coo,
        l_coord * loc + contain + l_noobj * no_contain + cls,
        l_noobj * noobj,
    )

    # Lane-dense (8, 128) per-block partial sum: fold sublane groups with plain
    # vreg adds (no XLU), keep the output store a full unmasked vreg and the
    # tail XLA reduction tiny.  Each block writes its own output -> steps are
    # independent ("parallel" grid axis).
    block_rows = per_cell.shape[0]
    partial = per_cell[0:_SUBLANES, :]
    for r in range(_SUBLANES, block_rows, _SUBLANES):
        partial = partial + per_cell[r:r + _SUBLANES, :]
    out_ref[0] = partial


def yolo_loss(pred_tensor, target_tensor, S=7, B=2, l_coord=5.0, l_noobj=0.5,
              block_rows=64):
    """pred_tensor / target_tensor: (N, S, S, B*5 + CLASS_NUM) -> scalar loss."""
    N = pred_tensor.shape[0]
    D = pred_tensor.shape[-1]
    assert D == B * 5 + CLASS_NUM
    assert pred_tensor.shape == target_tensor.shape == (N, S, S, D)

    C = N * S * S
    rows_needed = -(-C // _LANES)                               # ceil(C / 128)
    rows_needed = -(-rows_needed // _SUBLANES) * _SUBLANES      # multiple of 8 sublanes
    block_rows = -(-block_rows // _SUBLANES) * _SUBLANES
    block_rows = min(block_rows, rows_needed)
    cells_per_block = block_rows * _LANES
    num_blocks = -(-C // cells_per_block)
    c_pad = num_blocks * cells_per_block
    r_total = c_pad // _LANES

    def to_kernel_layout(x):
        # (N,S,S,D) -> channel-major, sublane/lane-dense (D, r_total, 128).
        # Keeps the input dtype (bf16 inputs are upcast inside the kernel).
        # TODO(synk): fold this transpose/pad into the kernel (DMA native (cells, D)
        # tiles and densify via the XLU) to cut the extra XLA HBM round trip.
        chan = jnp.transpose(x.reshape(C, D))                   # (D, C)
        chan = jnp.pad(chan, ((0, 0), (0, c_pad - C)))
        return chan.reshape(D, r_total, _LANES)

    p = to_kernel_layout(pred_tensor)
    t = to_kernel_layout(target_tensor)

    kernel = functools.partial(
        _yolo_loss_kernel,
        S=float(S), l_coord=float(l_coord), l_noobj=float(l_noobj))

    cost = pl.CostEstimate(
        flops=140 * c_pad,
        transcendentals=6 * c_pad,
        bytes_accessed=2 * D * c_pad * pred_tensor.dtype.itemsize
        + num_blocks * _SUBLANES * _LANES * 4)

    partials = pl.pallas_call(
        kernel,
        out_shape=jax.ShapeDtypeStruct((num_blocks, _SUBLANES, _LANES), jnp.float32),
        grid=(num_blocks,),
        in_specs=[
            pl.BlockSpec((D, block_rows, _LANES), lambda i: (0, i, 0)),
            pl.BlockSpec((D, block_rows, _LANES), lambda i: (0, i, 0)),
        ],
        out_specs=pl.BlockSpec((1, _SUBLANES, _LANES), lambda i: (i, 0, 0)),
        compiler_params=pltpu.CompilerParams(
            dimension_semantics=("parallel",)),  # independent blocks -> megacore on v7x
        cost_estimate=cost,
    )(p, t)

    # Tiny tail reduction (num_blocks*8*128 floats) + normalisation by batch size.
    return jnp.sum(partials) / jnp.float32(N)


def yolo_loss_ref(pred, target, S=7, l_coord=5.0, l_noobj=0.5):
    """Pure-JAX reference of yoloLoss.forward (same math, exact division)."""
    N = pred.shape[0]
    p = pred.reshape(-1, pred.shape[-1]).astype(jnp.float32)
    t = target.reshape(-1, target.shape[-1]).astype(jnp.float32)
    coo = t[:, 4] > 0.0

    def corners(b):
        cx, cy = b[:, 0] / S, b[:, 1] / S
        return cx - 0.5 * b[:, 2], cy - 0.5 * b[:, 3], cx + 0.5 * b[:, 2], cy + 0.5 * b[:, 3]

    def iou(pb, tb):
        px1, py1, px2, py2 = corners(pb)
        tx1, ty1, tx2, ty2 = corners(tb)
        w = jnp.maximum(jnp.minimum(px2, tx2) - jnp.maximum(px1, tx1), 0.0)
        h = jnp.maximum(jnp.minimum(py2, ty2) - jnp.maximum(py1, ty1), 0.0)
        inter = w * h
        pa = (px2 - px1) * (py2 - py1)
        ta = (tx2 - tx1) * (ty2 - ty1)
        return inter / jnp.maximum(pa + ta - inter, 1e-12)

    b0, b1 = p[:, 0:5], p[:, 5:10]
    tb0, tb1 = t[:, 0:5], t[:, 5:10]
    iou0, iou1 = iou(b0, tb0), iou(b1, tb0)
    resp1 = iou1 > iou0
    max_iou = jnp.maximum(iou0, iou1)
    rb = jnp.where(resp1[:, None], b1, b0)
    nrb = jnp.where(resp1[:, None], b0, b1)
    rt = jnp.where(resp1[:, None], tb1, tb0)
    contain = (rb[:, 4] - max_iou) ** 2
    no_contain = nrb[:, 4] ** 2
    loc = ((rb[:, 0] - rt[:, 0]) ** 2 + (rb[:, 1] - rt[:, 1]) ** 2
           + (jnp.sqrt(rb[:, 2]) - jnp.sqrt(rt[:, 2])) ** 2
           + (jnp.sqrt(rb[:, 3]) - jnp.sqrt(rt[:, 3])) ** 2)
    noobj = (p[:, 4] - t[:, 4]) ** 2 + (p[:, 9] - t[:, 9]) ** 2
    cls = jnp.sum((p[:, 10:] - t[:, 10:]) ** 2, axis=-1)
    per_cell = jnp.where(coo, l_coord * loc + contain + l_noobj * no_contain + cls,
                         l_noobj * noobj)
    return jnp.sum(per_cell) / N


if __name__ == "__main__":
    # yoloLoss(S=7, B=2, l_coord=5, l_noobj=0.5) with a small batch.
    N, S, B = 2, 7, 2
    D = B * 5 + CLASS_NUM

    key = jax.random.PRNGKey(0)
    k_pred, k_xy, k_wh, k_cls, k_obj = jax.random.split(key, 5)

    # Predictions: positive values so sqrt(w), sqrt(h) stay real (as in a trained net).
    pred = jax.random.uniform(k_pred, (N, S, S, D), jnp.float32, 0.05, 0.95)

    # Ground-truth target: some cells contain an object (conf=1 in both box slots),
    # both target boxes identical (standard YOLOv1 encoding), random class vector.
    obj = (jax.random.uniform(k_obj, (N, S, S, 1)) > 0.6).astype(jnp.float32)
    xy = jax.random.uniform(k_xy, (N, S, S, 2), jnp.float32, 0.0, 1.0)
    wh = jax.random.uniform(k_wh, (N, S, S, 2), jnp.float32, 0.1, 0.9)
    cls_probs = jax.random.uniform(k_cls, (N, S, S, CLASS_NUM), jnp.float32, 0.0, 1.0)
    box = jnp.concatenate([xy, wh, jnp.ones((N, S, S, 1), jnp.float32)], axis=-1)  # (x,y,w,h,c)
    target = jnp.concatenate([box, box, cls_probs], axis=-1) * obj                 # zero where no object

    loss_fn = jax.jit(functools.partial(yolo_loss, S=S, B=B, l_coord=5.0, l_noobj=0.5))
    loss = jax.block_until_ready(loss_fn(pred, target))

    ref = yolo_loss_ref(pred, target, S=S, l_coord=5.0, l_noobj=0.5)
    assert bool(jnp.isfinite(loss)), "loss is not finite"
    # Loose tolerance: kernel uses the EUP approximate reciprocal for the IoU divide.
    assert bool(jnp.allclose(loss, ref, rtol=5e-2, atol=5e-2)), (float(loss), float(ref))
    print("KERNEL_OK")
</pallas_src>

<mosaic_0001>
module attributes {stable_mosaic.version = 11 : i64} {
  func.func @_yolo_loss_kernel(%arg0: i32, %arg1: memref<30x8x128xf32, #tpu.memory_space<vmem>>, %arg2: memref<30x8x128xf32, #tpu.memory_space<vmem>>, %arg3: memref<1x8x128xf32, #tpu.memory_space<vmem>>) attributes {dimension_semantics = [#tpu.dimension_semantics<parallel>], iteration_bounds = array<i64: 1>, scalar_prefetch = 0 : i64, scratch_operands = 0 : i64, tpu.core_type = #tpu.core_type<tc>, window_params = [{transform_indices = @transform_0, window_bounds = array<i64: 30, 8, 128>}, {transform_indices = @transform_1, window_bounds = array<i64: 30, 8, 128>}, {transform_indices = @transform_2, window_bounds = array<i64: 1, 8, 128>}]} {
    %c0 = arith.constant 0 : index
    %c0_0 = arith.constant 0 : index
    %c0_1 = arith.constant 0 : index
    %0 = vector.load %arg1[%c0, %c0_0, %c0_1] : memref<30x8x128xf32, #tpu.memory_space<vmem>>, vector<1x8x128xf32>
    %1 = vector.shape_cast %0 : vector<1x8x128xf32> to vector<8x128xf32>
    %c1 = arith.constant 1 : index
    %c0_2 = arith.constant 0 : index
    %c0_3 = arith.constant 0 : index
    %2 = vector.load %arg1[%c1, %c0_2, %c0_3] : memref<30x8x128xf32, #tpu.memory_space<vmem>>, vector<1x8x128xf32>
    %3 = vector.shape_cast %2 : vector<1x8x128xf32> to vector<8x128xf32>
    %c2 = arith.constant 2 : index
    %c0_4 = arith.constant 0 : index
    %c0_5 = arith.constant 0 : index
    %4 = vector.load %arg1[%c2, %c0_4, %c0_5] : memref<30x8x128xf32, #tpu.memory_space<vmem>>, vector<1x8x128xf32>
    %5 = vector.shape_cast %4 : vector<1x8x128xf32> to vector<8x128xf32>
    %c3 = arith.constant 3 : index
    %c0_6 = arith.constant 0 : index
    %c0_7 = arith.constant 0 : index
    %6 = vector.load %arg1[%c3, %c0_6, %c0_7] : memref<30x8x128xf32, #tpu.memory_space<vmem>>, vector<1x8x128xf32>
    %7 = vector.shape_cast %6 : vector<1x8x128xf32> to vector<8x128xf32>
    %c4 = arith.constant 4 : index
    %c0_8 = arith.constant 0 : index
    %c0_9 = arith.constant 0 : index
    %8 = vector.load %arg1[%c4, %c0_8, %c0_9] : memref<30x8x128xf32, #tpu.memory_space<vmem>>, vector<1x8x128xf32>
    %9 = vector.shape_cast %8 : vector<1x8x128xf32> to vector<8x128xf32>
    %c5 = arith.constant 5 : index
    %c0_10 = arith.constant 0 : index
    %c0_11 = arith.constant 0 : index
    %10 = vector.load %arg1[%c5, %c0_10, %c0_11] : memref<30x8x128xf32, #tpu.memory_space<vmem>>, vector<1x8x128xf32>
    %11 = vector.shape_cast %10 : vector<1x8x128xf32> to vector<8x128xf32>
    %c6 = arith.constant 6 : index
    %c0_12 = arith.constant 0 : index
    %c0_13 = arith.constant 0 : index
    %12 = vector.load %arg1[%c6, %c0_12, %c0_13] : memref<30x8x128xf32, #tpu.memory_space<vmem>>, vector<1x8x128xf32>
    %13 = vector.shape_cast %12 : vector<1x8x128xf32> to vector<8x128xf32>
    %c7 = arith.constant 7 : index
    %c0_14 = arith.constant 0 : index
    %c0_15 = arith.constant 0 : index
    %14 = vector.load %arg1[%c7, %c0_14, %c0_15] : memref<30x8x128xf32, #tpu.memory_space<vmem>>, vector<1x8x128xf32>
    %15 = vector.shape_cast %14 : vector<1x8x128xf32> to vector<8x128xf32>
    %c8 = arith.constant 8 : index
    %c0_16 = arith.constant 0 : index
    %c0_17 = arith.constant 0 : index
    %16 = vector.load %arg1[%c8, %c0_16, %c0_17] : memref<30x8x128xf32, #tpu.memory_space<vmem>>, vector<1x8x128xf32>
    %17 = vector.shape_cast %16 : vector<1x8x128xf32> to vector<8x128xf32>
    %c9 = arith.constant 9 : index
    %c0_18 = arith.constant 0 : index
    %c0_19 = arith.constant 0 : index
    %18 = vector.load %arg1[%c9, %c0_18, %c0_19] : memref<30x8x128xf32, #tpu.memory_space<vmem>>, vector<1x8x128xf32>
    %19 = vector.shape_cast %18 : vector<1x8x128xf32> to vector<8x128xf32>
    %c0_20 = arith.constant 0 : index
    %c0_21 = arith.constant 0 : index
    %c0_22 = arith.constant 0 : index
    %20 = vector.load %arg2[%c0_20, %c0_21, %c0_22] : memref<30x8x128xf32, #tpu.memory_space<vmem>>, vector<1x8x128xf32>
    %21 = vector.shape_cast %20 : vector<1x8x128xf32> to vector<8x128xf32>
    %c1_23 = arith.constant 1 : index
    %c0_24 = arith.constant 0 : index
    %c0_25 = arith.constant 0 : index
    %22 = vector.load %arg2[%c1_23, %c0_24, %c0_25] : memref<30x8x128xf32, #tpu.memory_space<vmem>>, vector<1x8x128xf32>
    %23 = vector.shape_cast %22 : vector<1x8x128xf32> to vector<8x128xf32>
    %c2_26 = arith.constant 2 : index
    %c0_27 = arith.constant 0 : index
    %c0_28 = arith.constant 0 : index
    %24 = vector.load %arg2[%c2_26, %c0_27, %c0_28] : memref<30x8x128xf32, #tpu.memory_space<vmem>>, vector<1x8x128xf32>
    %25 = vector.shape_cast %24 : vector<1x8x128xf32> to vector<8x128xf32>
    %c3_29 = arith.constant 3 : index
    %c0_30 = arith.constant 0 : index
    %c0_31 = arith.constant 0 : index
    %26 = vector.load %arg2[%c3_29, %c0_30, %c0_31] : memref<30x8x128xf32, #tpu.memory_space<vmem>>, vector<1x8x128xf32>
    %27 = vector.shape_cast %26 : vector<1x8x128xf32> to vector<8x128xf32>
    %c4_32 = arith.constant 4 : index
    %c0_33 = arith.constant 0 : index
    %c0_34 = arith.constant 0 : index
    %28 = vector.load %arg2[%c4_32, %c0_33, %c0_34] : memref<30x8x128xf32, #tpu.memory_space<vmem>>, vector<1x8x128xf32>
    %29 = vector.shape_cast %28 : vector<1x8x128xf32> to vector<8x128xf32>
    %c5_35 = arith.constant 5 : index
    %c0_36 = arith.constant 0 : index
    %c0_37 = arith.constant 0 : index
    %30 = vector.load %arg2[%c5_35, %c0_36, %c0_37] : memref<30x8x128xf32, #tpu.memory_space<vmem>>, vector<1x8x128xf32>
    %31 = vector.shape_cast %30 : vector<1x8x128xf32> to vector<8x128xf32>
    %c6_38 = arith.constant 6 : index
    %c0_39 = arith.constant 0 : index
    %c0_40 = arith.constant 0 : index
    %32 = vector.load %arg2[%c6_38, %c0_39, %c0_40] : memref<30x8x128xf32, #tpu.memory_space<vmem>>, vector<1x8x128xf32>
    %33 = vector.shape_cast %32 : vector<1x8x128xf32> to vector<8x128xf32>
    %c7_41 = arith.constant 7 : index
    %c0_42 = arith.constant 0 : index
    %c0_43 = arith.constant 0 : index
    %34 = vector.load %arg2[%c7_41, %c0_42, %c0_43] : memref<30x8x128xf32, #tpu.memory_space<vmem>>, vector<1x8x128xf32>
    %35 = vector.shape_cast %34 : vector<1x8x128xf32> to vector<8x128xf32>
    %c8_44 = arith.constant 8 : index
    %c0_45 = arith.constant 0 : index
    %c0_46 = arith.constant 0 : index
    %36 = vector.load %arg2[%c8_44, %c0_45, %c0_46] : memref<30x8x128xf32, #tpu.memory_space<vmem>>, vector<1x8x128xf32>
    %37 = vector.shape_cast %36 : vector<1x8x128xf32> to vector<8x128xf32>
    %c9_47 = arith.constant 9 : index
    %c0_48 = arith.constant 0 : index
    %c0_49 = arith.constant 0 : index
    %38 = vector.load %arg2[%c9_47, %c0_48, %c0_49] : memref<30x8x128xf32, #tpu.memory_space<vmem>>, vector<1x8x128xf32>
    %39 = vector.shape_cast %38 : vector<1x8x128xf32> to vector<8x128xf32>
    %cst = arith.constant 0.000000e+00 : f32
    %40 = vector.broadcast %cst : f32 to vector<8x128xf32>
    %41 = arith.cmpf ogt, %29, %40 : vector<8x128xf32>
    %cst_50 = arith.constant 0.142857149 : f32
    %42 = vector.broadcast %cst_50 : f32 to vector<8x128xf32>
    %43 = arith.mulf %21, %42 : vector<8x128xf32>
    %cst_51 = arith.constant 0.142857149 : f32
    %44 = vector.broadcast %cst_51 : f32 to vector<8x128xf32>
    %45 = arith.mulf %23, %44 : vector<8x128xf32>
    %cst_52 = arith.constant 5.000000e-01 : f32
    %46 = vector.broadcast %cst_52 : f32 to vector<8x128xf32>
    %47 = arith.mulf %46, %25 : vector<8x128xf32>
    %48 = arith.subf %43, %47 : vector<8x128xf32>
    %cst_53 = arith.constant 5.000000e-01 : f32
    %49 = vector.broadcast %cst_53 : f32 to vector<8x128xf32>
    %50 = arith.mulf %49, %27 : vector<8x128xf32>
    %51 = arith.subf %45, %50 : vector<8x128xf32>
    %cst_54 = arith.constant 5.000000e-01 : f32
    %52 = vector.broadcast %cst_54 : f32 to vector<8x128xf32>
    %53 = arith.mulf %52, %25 : vector<8x128xf32>
    %54 = arith.addf %43, %53 : vector<8x128xf32>
    %cst_55 = arith.constant 5.000000e-01 : f32
    %55 = vector.broadcast %cst_55 : f32 to vector<8x128xf32>
    %56 = arith.mulf %55, %27 : vector<8x128xf32>
    %57 = arith.addf %45, %56 : vector<8x128xf32>
    %58 = arith.subf %54, %48 : vector<8x128xf32>
    %59 = arith.subf %57, %51 : vector<8x128xf32>
    %60 = arith.mulf %58, %59 : vector<8x128xf32>
    %cst_56 = arith.constant 0.142857149 : f32
    %61 = vector.broadcast %cst_56 : f32 to vector<8x128xf32>
    %62 = arith.mulf %1, %61 : vector<8x128xf32>
    %cst_57 = arith.constant 0.142857149 : f32
    %63 = vector.broadcast %cst_57 : f32 to vector<8x128xf32>
    %64 = arith.mulf %3, %63 : vector<8x128xf32>
    %cst_58 = arith.constant 5.000000e-01 : f32
    %65 = vector.broadcast %cst_58 : f32 to vector<8x128xf32>
    %66 = arith.mulf %65, %5 : vector<8x128xf32>
    %67 = arith.subf %62, %66 : vector<8x128xf32>
    %cst_59 = arith.constant 5.000000e-01 : f32
    %68 = vector.broadcast %cst_59 : f32 to vector<8x128xf32>
    %69 = arith.mulf %68, %7 : vector<8x128xf32>
    %70 = arith.subf %64, %69 : vector<8x128xf32>
    %cst_60 = arith.constant 5.000000e-01 : f32
    %71 = vector.broadcast %cst_60 : f32 to vector<8x128xf32>
    %72 = arith.mulf %71, %5 : vector<8x128xf32>
    %73 = arith.addf %62, %72 : vector<8x128xf32>
    %cst_61 = arith.constant 5.000000e-01 : f32
    %74 = vector.broadcast %cst_61 : f32 to vector<8x128xf32>
    %75 = arith.mulf %74, %7 : vector<8x128xf32>
    %76 = arith.addf %64, %75 : vector<8x128xf32>
    %77 = arith.minimumf %73, %54 : vector<8x128xf32>
    %78 = arith.maximumf %67, %48 : vector<8x128xf32>
    %79 = arith.subf %77, %78 : vector<8x128xf32>
    %cst_62 = arith.constant 0.000000e+00 : f32
    %80 = vector.broadcast %cst_62 : f32 to vector<8x128xf32>
    %81 = arith.maximumf %79, %80 : vector<8x128xf32>
    %82 = arith.minimumf %76, %57 : vector<8x128xf32>
    %83 = arith.maximumf %70, %51 : vector<8x128xf32>
    %84 = arith.subf %82, %83 : vector<8x128xf32>
    %cst_63 = arith.constant 0.000000e+00 : f32
    %85 = vector.broadcast %cst_63 : f32 to vector<8x128xf32>
    %86 = arith.maximumf %84, %85 : vector<8x128xf32>
    %87 = arith.mulf %81, %86 : vector<8x128xf32>
    %88 = arith.subf %73, %67 : vector<8x128xf32>
    %89 = arith.subf %76, %70 : vector<8x128xf32>
    %90 = arith.mulf %88, %89 : vector<8x128xf32>
    %91 = arith.addf %90, %60 : vector<8x128xf32>
    %92 = arith.subf %91, %87 : vector<8x128xf32>
    %cst_64 = arith.constant 9.99999996E-13 : f32
    %93 = vector.broadcast %cst_64 : f32 to vector<8x128xf32>
    %94 = arith.maximumf %92, %93 : vector<8x128xf32>
    %95 = tpu.reciprocal %94 {approx = true} : vector<8x128xf32> -> vector<8x128xf32>
    %96 = arith.mulf %87, %95 : vector<8x128xf32>
    %cst_65 = arith.constant 0.142857149 : f32
    %97 = vector.broadcast %cst_65 : f32 to vector<8x128xf32>
    %98 = arith.mulf %11, %97 : vector<8x128xf32>
    %cst_66 = arith.constant 0.142857149 : f32
    %99 = vector.broadcast %cst_66 : f32 to vector<8x128xf32>
    %100 = arith.mulf %13, %99 : vector<8x128xf32>
    %cst_67 = arith.constant 5.000000e-01 : f32
    %101 = vector.broadcast %cst_67 : f32 to vector<8x128xf32>
    %102 = arith.mulf %101, %15 : vector<8x128xf32>
    %103 = arith.subf %98, %102 : vector<8x128xf32>
    %cst_68 = arith.constant 5.000000e-01 : f32
    %104 = vector.broadcast %cst_68 : f32 to vector<8x128xf32>
    %105 = arith.mulf %104, %17 : vector<8x128xf32>
    %106 = arith.subf %100, %105 : vector<8x128xf32>
    %cst_69 = arith.constant 5.000000e-01 : f32
    %107 = vector.broadcast %cst_69 : f32 to vector<8x128xf32>
    %108 = arith.mulf %107, %15 : vector<8x128xf32>
    %109 = arith.addf %98, %108 : vector<8x128xf32>
    %cst_70 = arith.constant 5.000000e-01 : f32
    %110 = vector.broadcast %cst_70 : f32 to vector<8x128xf32>
    %111 = arith.mulf %110, %17 : vector<8x128xf32>
    %112 = arith.addf %100, %111 : vector<8x128xf32>
    %113 = arith.minimumf %109, %54 : vector<8x128xf32>
    %114 = arith.maximumf %103, %48 : vector<8x128xf32>
    %115 = arith.subf %113, %114 : vector<8x128xf32>
    %cst_71 = arith.constant 0.000000e+00 : f32
    %116 = vector.broadcast %cst_71 : f32 to vector<8x128xf32>
    %117 = arith.maximumf %115, %116 : vector<8x128xf32>
    %118 = arith.minimumf %112, %57 : vector<8x128xf32>
    %119 = arith.maximumf %106, %51 : vector<8x128xf32>
    %120 = arith.subf %118, %119 : vector<8x128xf32>
    %cst_72 = arith.constant 0.000000e+00 : f32
    %121 = vector.broadcast %cst_72 : f32 to vector<8x128xf32>
    %122 = arith.maximumf %120, %121 : vector<8x128xf32>
    %123 = arith.mulf %117, %122 : vector<8x128xf32>
    %124 = arith.subf %109, %103 : vector<8x128xf32>
    %125 = arith.subf %112, %106 : vector<8x128xf32>
    %126 = arith.mulf %124, %125 : vector<8x128xf32>
    %127 = arith.addf %126, %60 : vector<8x128xf32>
    %128 = arith.subf %127, %123 : vector<8x128xf32>
    %cst_73 = arith.constant 9.99999996E-13 : f32
    %129 = vector.broadcast %cst_73 : f32 to vector<8x128xf32>
    %130 = arith.maximumf %128, %129 : vector<8x128xf32>
    %131 = tpu.reciprocal %130 {approx = true} : vector<8x128xf32> -> vector<8x128xf32>
    %132 = arith.mulf %123, %131 : vector<8x128xf32>
    %133 = arith.cmpf ogt, %132, %96 : vector<8x128xf32>
    %134 = arith.maximumf %96, %132 : vector<8x128xf32>
    %135 = arith.select %133, %11, %1 : vector<8x128xi1>, vector<8x128xf32>
    %136 = arith.select %133, %13, %3 : vector<8x128xi1>, vector<8x128xf32>
    %137 = arith.select %133, %15, %5 : vector<8x128xi1>, vector<8x128xf32>
    %138 = arith.select %133, %17, %7 : vector<8x128xi1>, vector<8x128xf32>
    %139 = arith.select %133, %19, %9 : vector<8x128xi1>, vector<8x128xf32>
    %140 = arith.select %133, %9, %19 : vector<8x128xi1>, vector<8x128xf32>
    %141 = arith.select %133, %31, %21 : vector<8x128xi1>, vector<8x128xf32>
    %142 = arith.select %133, %33, %23 : vector<8x128xi1>, vector<8x128xf32>
    %143 = arith.select %133, %35, %25 : vector<8x128xi1>, vector<8x128xf32>
    %144 = arith.select %133, %37, %27 : vector<8x128xi1>, vector<8x128xf32>
    %145 = arith.subf %139, %134 : vector<8x128xf32>
    %146 = arith.mulf %145, %145 : vector<8x128xf32>
    %147 = arith.mulf %140, %140 : vector<8x128xf32>
    %148 = arith.subf %135, %141 : vector<8x128xf32>
    %149 = arith.mulf %148, %148 : vector<8x128xf32>
    %150 = arith.subf %136, %142 : vector<8x128xf32>
    %151 = arith.mulf %150, %150 : vector<8x128xf32>
    %152 = arith.addf %149, %151 : vector<8x128xf32>
    %153 = math.sqrt %137 : vector<8x128xf32>
    %154 = math.sqrt %143 : vector<8x128xf32>
    %155 = arith.subf %153, %154 : vector<8x128xf32>
    %156 = arith.mulf %155, %155 : vector<8x128xf32>
    %157 = arith.addf %152, %156 : vector<8x128xf32>
    %158 = math.sqrt %138 : vector<8x128xf32>
    %159 = math.sqrt %144 : vector<8x128xf32>
    %160 = arith.subf %158, %159 : vector<8x128xf32>
    %161 = arith.mulf %160, %160 : vector<8x128xf32>
    %162 = arith.addf %157, %161 : vector<8x128xf32>
    %163 = arith.subf %9, %29 : vector<8x128xf32>
    %164 = arith.mulf %163, %163 : vector<8x128xf32>
    %165 = arith.subf %19, %39 : vector<8x128xf32>
    %166 = arith.mulf %165, %165 : vector<8x128xf32>
    %167 = arith.addf %164, %166 : vector<8x128xf32>
    %c10 = arith.constant 10 : index
    %c0_74 = arith.constant 0 : index
    %c0_75 = arith.constant 0 : index
    %168 = vector.load %arg1[%c10, %c0_74, %c0_75] : memref<30x8x128xf32, #tpu.memory_space<vmem>>, vector<1x8x128xf32>
    %169 = vector.shape_cast %168 : vector<1x8x128xf32> to vector<8x128xf32>
    %c10_76 = arith.constant 10 : index
    %c0_77 = arith.constant 0 : index
    %c0_78 = arith.constant 0 : index
    %170 = vector.load %arg2[%c10_76, %c0_77, %c0_78] : memref<30x8x128xf32, #tpu.memory_space<vmem>>, vector<1x8x128xf32>
    %171 = vector.shape_cast %170 : vector<1x8x128xf32> to vector<8x128xf32>
    %172 = arith.subf %169, %171 : vector<8x128xf32>
    %173 = arith.mulf %172, %172 : vector<8x128xf32>
    %c11 = arith.constant 11 : index
    %c0_79 = arith.constant 0 : index
    %c0_80 = arith.constant 0 : index
    %174 = vector.load %arg1[%c11, %c0_79, %c0_80] : memref<30x8x128xf32, #tpu.memory_space<vmem>>, vector<1x8x128xf32>
    %175 = vector.shape_cast %174 : vector<1x8x128xf32> to vector<8x128xf32>
    %c11_81 = arith.constant 11 : index
    %c0_82 = arith.constant 0 : index
    %c0_83 = arith.constant 0 : index
    %176 = vector.load %arg2[%c11_81, %c0_82, %c0_83] : memref<30x8x128xf32, #tpu.memory_space<vmem>>, vector<1x8x128xf32>
    %177 = vector.shape_cast %176 : vector<1x8x128xf32> to vector<8x128xf32>
    %178 = arith.subf %175, %177 : vector<8x128xf32>
    %179 = arith.mulf %178, %178 : vector<8x128xf32>
    %180 = arith.addf %173, %179 : vector<8x128xf32>
    %c12 = arith.constant 12 : index
    %c0_84 = arith.constant 0 : index
    %c0_85 = arith.constant 0 : index
    %181 = vector.load %arg1[%c12, %c0_84, %c0_85] : memref<30x8x128xf32, #tpu.memory_space<vmem>>, vector<1x8x128xf32>
    %182 = vector.shape_cast %181 : vector<1x8x128xf32> to vector<8x128xf32>
    %c12_86 = arith.constant 12 : index
    %c0_87 = arith.constant 0 : index
    %c0_88 = arith.constant 0 : index
    %183 = vector.load %arg2[%c12_86, %c0_87, %c0_88] : memref<30x8x128xf32, #tpu.memory_space<vmem>>, vector<1x8x128xf32>
    %184 = vector.shape_cast %183 : vector<1x8x128xf32> to vector<8x128xf32>
    %185 = arith.subf %182, %184 : vector<8x128xf32>
    %186 = arith.mulf %185, %185 : vector<8x128xf32>
    %187 = arith.addf %180, %186 : vector<8x128xf32>
    %c13 = arith.constant 13 : index
    %c0_89 = arith.constant 0 : index
    %c0_90 = arith.constant 0 : index
    %188 = vector.load %arg1[%c13, %c0_89, %c0_90] : memref<30x8x128xf32, #tpu.memory_space<vmem>>, vector<1x8x128xf32>
    %189 = vector.shape_cast %188 : vector<1x8x128xf32> to vector<8x128xf32>
    %c13_91 = arith.constant 13 : index
    %c0_92 = arith.constant 0 : index
    %c0_93 = arith.constant 0 : index
    %190 = vector.load %arg2[%c13_91, %c0_92, %c0_93] : memref<30x8x128xf32, #tpu.memory_space<vmem>>, vector<1x8x128xf32>
    %191 = vector.shape_cast %190 : vector<1x8x128xf32> to vector<8x128xf32>
    %192 = arith.subf %189, %191 : vector<8x128xf32>
    %193 = arith.mulf %192, %192 : vector<8x128xf32>
    %194 = arith.addf %187, %193 : vector<8x128xf32>
    %c14 = arith.constant 14 : index
    %c0_94 = arith.constant 0 : index
    %c0_95 = arith.constant 0 : index
    %195 = vector.load %arg1[%c14, %c0_94, %c0_95] : memref<30x8x128xf32, #tpu.memory_space<vmem>>, vector<1x8x128xf32>
    %196 = vector.shape_cast %195 : vector<1x8x128xf32> to vector<8x128xf32>
    %c14_96 = arith.constant 14 : index
    %c0_97 = arith.constant 0 : index
    %c0_98 = arith.constant 0 : index
    %197 = vector.load %arg2[%c14_96, %c0_97, %c0_98] : memref<30x8x128xf32, #tpu.memory_space<vmem>>, vector<1x8x128xf32>
    %198 = vector.shape_cast %197 : vector<1x8x128xf32> to vector<8x128xf32>
    %199 = arith.subf %196, %198 : vector<8x128xf32>
    %200 = arith.mulf %199, %199 : vector<8x128xf32>
    %201 = arith.addf %194, %200 : vector<8x128xf32>
    %c15 = arith.constant 15 : index
    %c0_99 = arith.constant 0 : index
    %c0_100 = arith.constant 0 : index
    %202 = vector.load %arg1[%c15, %c0_99, %c0_100] : memref<30x8x128xf32, #tpu.memory_space<vmem>>, vector<1x8x128xf32>
    %203 = vector.shape_cast %202 : vector<1x8x128xf32> to vector<8x128xf32>
    %c15_101 = arith.constant 15 : index
    %c0_102 = arith.constant 0 : index
    %c0_103 = arith.constant 0 : index
    %204 = vector.load %arg2[%c15_101, %c0_102, %c0_103] : memref<30x8x128xf32, #tpu.memory_space<vmem>>, vector<1x8x128xf32>
    %205 = vector.shape_cast %204 : vector<1x8x128xf32> to vector<8x128xf32>
    %206 = arith.subf %203, %205 : vector<8x128xf32>
    %207 = arith.mulf %206, %206 : vector<8x128xf32>
    %208 = arith.addf %201, %207 : vector<8x128xf32>
    %c16 = arith.constant 16 : index
    %c0_104 = arith.constant 0 : index
    %c0_105 = arith.constant 0 : index
    %209 = vector.load %arg1[%c16, %c0_104, %c0_105] : memref<30x8x128xf32, #tpu.memory_space<vmem>>, vector<1x8x128xf32>
    %210 = vector.shape_cast %209 : vector<1x8x128xf32> to vector<8x128xf32>
    %c16_106 = arith.constant 16 : index
    %c0_107 = arith.constant 0 : index
    %c0_108 = arith.constant 0 : index
    %211 = vector.load %arg2[%c16_106, %c0_107, %c0_108] : memref<30x8x128xf32, #tpu.memory_space<vmem>>, vector<1x8x128xf32>
    %212 = vector.shape_cast %211 : vector<1x8x128xf32> to vector<8x128xf32>
    %213 = arith.subf %210, %212 : vector<8x128xf32>
    %214 = arith.mulf %213, %213 : vector<8x128xf32>
    %215 = arith.addf %208, %214 : vector<8x128xf32>
    %c17 = arith.constant 17 : index
    %c0_109 = arith.constant 0 : index
    %c0_110 = arith.constant 0 : index
    %216 = vector.load %arg1[%c17, %c0_109, %c0_110] : memref<30x8x128xf32, #tpu.memory_space<vmem>>, vector<1x8x128xf32>
    %217 = vector.shape_cast %216 : vector<1x8x128xf32> to vector<8x128xf32>
    %c17_111 = arith.constant 17 : index
    %c0_112 = arith.constant 0 : index
    %c0_113 = arith.constant 0 : index
    %218 = vector.load %arg2[%c17_111, %c0_112, %c0_113] : memref<30x8x128xf32, #tpu.memory_space<vmem>>, vector<1x8x128xf32>
    %219 = vector.shape_cast %218 : vector<1x8x128xf32> to vector<8x128xf32>
    %220 = arith.subf %217, %219 : vector<8x128xf32>
    %221 = arith.mulf %220, %220 : vector<8x128xf32>
    %222 = arith.addf %215, %221 : vector<8x128xf32>
    %c18 = arith.constant 18 : index
    %c0_114 = arith.constant 0 : index
    %c0_115 = arith.constant 0 : index
    %223 = vector.load %arg1[%c18, %c0_114, %c0_115] : memref<30x8x128xf32, #tpu.memory_space<vmem>>, vector<1x8x128xf32>
    %224 = vector.shape_cast %223 : vector<1x8x128xf32> to vector<8x128xf32>
    %c18_116 = arith.constant 18 : index
    %c0_117 = arith.constant 0 : index
    %c0_118 = arith.constant 0 : index
    %225 = vector.load %arg2[%c18_116, %c0_117, %c0_118] : memref<30x8x128xf32, #tpu.memory_space<vmem>>, vector<1x8x128xf32>
    %226 = vector.shape_cast %225 : vector<1x8x128xf32> to vector<8x128xf32>
    %227 = arith.subf %224, %226 : vector<8x128xf32>
    %228 = arith.mulf %227, %227 : vector<8x128xf32>
    %229 = arith.addf %222, %228 : vector<8x128xf32>
    %c19 = arith.constant 19 : index
    %c0_119 = arith.constant 0 : index
    %c0_120 = arith.constant 0 : index
    %230 = vector.load %arg1[%c19, %c0_119, %c0_120] : memref<30x8x128xf32, #tpu.memory_space<vmem>>, vector<1x8x128xf32>
    %231 = vector.shape_cast %230 : vector<1x8x128xf32> to vector<8x128xf32>
    %c19_121 = arith.constant 19 : index
    %c0_122 = arith.constant 0 : index
    %c0_123 = arith.constant 0 : index
    %232 = vector.load %arg2[%c19_121, %c0_122, %c0_123] : memref<30x8x128xf32, #tpu.memory_space<vmem>>, vector<1x8x128xf32>
    %233 = vector.shape_cast %232 : vector<1x8x128xf32> to vector<8x128xf32>
    %234 = arith.subf %231, %233 : vector<8x128xf32>
    %235 = arith.mulf %234, %234 : vector<8x128xf32>
    %236 = arith.addf %229, %235 : vector<8x128xf32>
    %c20 = arith.constant 20 : index
    %c0_124 = arith.constant 0 : index
    %c0_125 = arith.constant 0 : index
    %237 = vector.load %arg1[%c20, %c0_124, %c0_125] : memref<30x8x128xf32, #tpu.memory_space<vmem>>, vector<1x8x128xf32>
    %238 = vector.shape_cast %237 : vector<1x8x128xf32> to vector<8x128xf32>
    %c20_126 = arith.constant 20 : index
    %c0_127 = arith.constant 0 : index
    %c0_128 = arith.constant 0 : index
    %239 = vector.load %arg2[%c20_126, %c0_127, %c0_128] : memref<30x8x128xf32, #tpu.memory_space<vmem>>, vector<1x8x128xf32>
    %240 = vector.shape_cast %239 : vector<1x8x128xf32> to vector<8x128xf32>
    %241 = arith.subf %238, %240 : vector<8x128xf32>
    %242 = arith.mulf %241, %241 : vector<8x128xf32>
    %243 = arith.addf %236, %242 : vector<8x128xf32>
    %c21 = arith.constant 21 : index
    %c0_129 = arith.constant 0 : index
    %c0_130 = arith.constant 0 : index
    %244 = vector.load %arg1[%c21, %c0_129, %c0_130] : memref<30x8x128xf32, #tpu.memory_space<vmem>>, vector<1x8x128xf32>
    %245 = vector.shape_cast %244 : vector<1x8x128xf32> to vector<8x128xf32>
    %c21_131 = arith.constant 21 : index
    %c0_132 = arith.constant 0 : index
    %c0_133 = arith.constant 0 : index
    %246 = vector.load %arg2[%c21_131, %c0_132, %c0_133] : memref<30x8x128xf32, #tpu.memory_space<vmem>>, vector<1x8x128xf32>
    %247 = vector.shape_cast %246 : vector<1x8x128xf32> to vector<8x128xf32>
    %248 = arith.subf %245, %247 : vector<8x128xf32>
    %249 = arith.mulf %248, %248 : vector<8x128xf32>
    %250 = arith.addf %243, %249 : vector<8x128xf32>
    %c22 = arith.constant 22 : index
    %c0_134 = arith.constant 0 : index
    %c0_135 = arith.constant 0 : index
    %251 = vector.load %arg1[%c22, %c0_134, %c0_135] : memref<30x8x128xf32, #tpu.memory_space<vmem>>, vector<1x8x128xf32>
    %252 = vector.shape_cast %251 : vector<1x8x128xf32> to vector<8x128xf32>
    %c22_136 = arith.constant 22 : index
    %c0_137 = arith.constant 0 : index
    %c0_138 = arith.constant 0 : index
    %253 = vector.load %arg2[%c22_136, %c0_137, %c0_138] : memref<30x8x128xf32, #tpu.memory_space<vmem>>, vector<1x8x128xf32>
    %254 = vector.shape_cast %253 : vector<1x8x128xf32> to vector<8x128xf32>
    %255 = arith.subf %252, %254 : vector<8x128xf32>
    %256 = arith.mulf %255, %255 : vector<8x128xf32>
    %257 = arith.addf %250, %256 : vector<8x128xf32>
    %c23 = arith.constant 23 : index
    %c0_139 = arith.constant 0 : index
    %c0_140 = arith.constant 0 : index
    %258 = vector.load %arg1[%c23, %c0_139, %c0_140] : memref<30x8x128xf32, #tpu.memory_space<vmem>>, vector<1x8x128xf32>
    %259 = vector.shape_cast %258 : vector<1x8x128xf32> to vector<8x128xf32>
    %c23_141 = arith.constant 23 : index
    %c0_142 = arith.constant 0 : index
    %c0_143 = arith.constant 0 : index
    %260 = vector.load %arg2[%c23_141, %c0_142, %c0_143] : memref<30x8x128xf32, #tpu.memory_space<vmem>>, vector<1x8x128xf32>
    %261 = vector.shape_cast %260 : vector<1x8x128xf32> to vector<8x128xf32>
    %262 = arith.subf %259, %261 : vector<8x128xf32>
    %263 = arith.mulf %262, %262 : vector<8x128xf32>
    %264 = arith.addf %257, %263 : vector<8x128xf32>
    %c24 = arith.constant 24 : index
    %c0_144 = arith.constant 0 : index
    %c0_145 = arith.constant 0 : index
    %265 = vector.load %arg1[%c24, %c0_144, %c0_145] : memref<30x8x128xf32, #tpu.memory_space<vmem>>, vector<1x8x128xf32>
    %266 = vector.shape_cast %265 : vector<1x8x128xf32> to vector<8x128xf32>
    %c24_146 = arith.constant 24 : index
    %c0_147 = arith.constant 0 : index
    %c0_148 = arith.constant 0 : index
    %267 = vector.load %arg2[%c24_146, %c0_147, %c0_148] : memref<30x8x128xf32, #tpu.memory_space<vmem>>, vector<1x8x128xf32>
    %268 = vector.shape_cast %267 : vector<1x8x128xf32> to vector<8x128xf32>
    %269 = arith.subf %266, %268 : vector<8x128xf32>
    %270 = arith.mulf %269, %269 : vector<8x128xf32>
    %271 = arith.addf %264, %270 : vector<8x128xf32>
    %c25 = arith.constant 25 : index
    %c0_149 = arith.constant 0 : index
    %c0_150 = arith.constant 0 : index
    %272 = vector.load %arg1[%c25, %c0_149, %c0_150] : memref<30x8x128xf32, #tpu.memory_space<vmem>>, vector<1x8x128xf32>
    %273 = vector.shape_cast %272 : vector<1x8x128xf32> to vector<8x128xf32>
    %c25_151 = arith.constant 25 : index
    %c0_152 = arith.constant 0 : index
    %c0_153 = arith.constant 0 : index
    %274 = vector.load %arg2[%c25_151, %c0_152, %c0_153] : memref<30x8x128xf32, #tpu.memory_space<vmem>>, vector<1x8x128xf32>
    %275 = vector.shape_cast %274 : vector<1x8x128xf32> to vector<8x128xf32>
    %276 = arith.subf %273, %275 : vector<8x128xf32>
    %277 = arith.mulf %276, %276 : vector<8x128xf32>
    %278 = arith.addf %271, %277 : vector<8x128xf32>
    %c26 = arith.constant 26 : index
    %c0_154 = arith.constant 0 : index
    %c0_155 = arith.constant 0 : index
    %279 = vector.load %arg1[%c26, %c0_154, %c0_155] : memref<30x8x128xf32, #tpu.memory_space<vmem>>, vector<1x8x128xf32>
    %280 = vector.shape_cast %279 : vector<1x8x128xf32> to vector<8x128xf32>
    %c26_156 = arith.constant 26 : index
    %c0_157 = arith.constant 0 : index
    %c0_158 = arith.constant 0 : index
    %281 = vector.load %arg2[%c26_156, %c0_157, %c0_158] : memref<30x8x128xf32, #tpu.memory_space<vmem>>, vector<1x8x128xf32>
    %282 = vector.shape_cast %281 : vector<1x8x128xf32> to vector<8x128xf32>
    %283 = arith.subf %280, %282 : vector<8x128xf32>
    %284 = arith.mulf %283, %283 : vector<8x128xf32>
    %285 = arith.addf %278, %284 : vector<8x128xf32>
    %c27 = arith.constant 27 : index
    %c0_159 = arith.constant 0 : index
    %c0_160 = arith.constant 0 : index
    %286 = vector.load %arg1[%c27, %c0_159, %c0_160] : memref<30x8x128xf32, #tpu.memory_space<vmem>>, vector<1x8x128xf32>
    %287 = vector.shape_cast %286 : vector<1x8x128xf32> to vector<8x128xf32>
    %c27_161 = arith.constant 27 : index
    %c0_162 = arith.constant 0 : index
    %c0_163 = arith.constant 0 : index
    %288 = vector.load %arg2[%c27_161, %c0_162, %c0_163] : memref<30x8x128xf32, #tpu.memory_space<vmem>>, vector<1x8x128xf32>
    %289 = vector.shape_cast %288 : vector<1x8x128xf32> to vector<8x128xf32>
    %290 = arith.subf %287, %289 : vector<8x128xf32>
    %291 = arith.mulf %290, %290 : vector<8x128xf32>
    %292 = arith.addf %285, %291 : vector<8x128xf32>
    %c28 = arith.constant 28 : index
    %c0_164 = arith.constant 0 : index
    %c0_165 = arith.constant 0 : index
    %293 = vector.load %arg1[%c28, %c0_164, %c0_165] : memref<30x8x128xf32, #tpu.memory_space<vmem>>, vector<1x8x128xf32>
    %294 = vector.shape_cast %293 : vector<1x8x128xf32> to vector<8x128xf32>
    %c28_166 = arith.constant 28 : index
    %c0_167 = arith.constant 0 : index
    %c0_168 = arith.constant 0 : index
    %295 = vector.load %arg2[%c28_166, %c0_167, %c0_168] : memref<30x8x128xf32, #tpu.memory_space<vmem>>, vector<1x8x128xf32>
    %296 = vector.shape_cast %295 : vector<1x8x128xf32> to vector<8x128xf32>
    %297 = arith.subf %294, %296 : vector<8x128xf32>
    %298 = arith.mulf %297, %297 : vector<8x128xf32>
    %299 = arith.addf %292, %298 : vector<8x128xf32>
    %c29 = arith.constant 29 : index
    %c0_169 = arith.constant 0 : index
    %c0_170 = arith.constant 0 : index
    %300 = vector.load %arg1[%c29, %c0_169, %c0_170] : memref<30x8x128xf32, #tpu.memory_space<vmem>>, vector<1x8x128xf32>
    %301 = vector.shape_cast %300 : vector<1x8x128xf32> to vector<8x128xf32>
    %c29_171 = arith.constant 29 : index
    %c0_172 = arith.constant 0 : index
    %c0_173 = arith.constant 0 : index
    %302 = vector.load %arg2[%c29_171, %c0_172, %c0_173] : memref<30x8x128xf32, #tpu.memory_space<vmem>>, vector<1x8x128xf32>
    %303 = vector.shape_cast %302 : vector<1x8x128xf32> to vector<8x128xf32>
    %304 = arith.subf %301, %303 : vector<8x128xf32>
    %305 = arith.mulf %304, %304 : vector<8x128xf32>
    %306 = arith.addf %299, %305 : vector<8x128xf32>
    %cst_174 = arith.constant 5.000000e+00 : f32
    %307 = vector.broadcast %cst_174 : f32 to vector<8x128xf32>
    %308 = arith.mulf %307, %162 : vector<8x128xf32>
    %309 = arith.addf %308, %146 : vector<8x128xf32>
    %cst_175 = arith.constant 5.000000e-01 : f32
    %310 = vector.broadcast %cst_175 : f32 to vector<8x128xf32>
    %311 = arith.mulf %310, %147 : vector<8x128xf32>
    %312 = arith.addf %309, %311 : vector<8x128xf32>
    %313 = arith.addf %312, %306 : vector<8x128xf32>
    %cst_176 = arith.constant 5.000000e-01 : f32
    %314 = vector.broadcast %cst_176 : f32 to vector<8x128xf32>
    %315 = arith.mulf %314, %167 : vector<8x128xf32>
    %316 = arith.select %41, %313, %315 : vector<8x128xi1>, vector<8x128xf32>
    %c0_177 = arith.constant 0 : index
    %c0_178 = arith.constant 0 : index
    %c0_179 = arith.constant 0 : index
    %317 = vector.load %arg3[%c0_177, %c0_178, %c0_179] : memref<1x8x128xf32, #tpu.memory_space<vmem>>, vector<1x8x128xf32>
    %318 = vector.shape_cast %317 : vector<1x8x128xf32> to vector<8x128xf32>
    %319 = vector.shape_cast %316 : vector<8x128xf32> to vector<1x8x128xf32>
    tpu.vector_store %arg3[%c0_177, %c0_178, %c0_179], %319 {strides = array<i32>} : memref<1x8x128xf32, #tpu.memory_space<vmem>>, vector<1x8x128xf32>,
    return
  }
  func.func @transform_0(%arg0: i32) -> (i32, i32, i32) {
    %c0_i32 = arith.constant 0 : i32
    %c0_i32_0 = arith.constant 0 : i32
    %c0_i32_1 = arith.constant 0 : i32
    return %c0_i32, %arg0, %c0_i32_0 : i32, i32, i32
  }
  func.func @transform_1(%arg0: i32) -> (i32, i32, i32) {
    %c0_i32 = arith.constant 0 : i32
    %c0_i32_0 = arith.constant 0 : i32
    %c0_i32_1 = arith.constant 0 : i32
    return %c0_i32, %arg0, %c0_i32_0 : i32, i32, i32
  }
  func.func @transform_2(%arg0: i32) -> (i32, i32, i32) {
    %c0_i32 = arith.constant 0 : i32
    %c0_i32_0 = arith.constant 0 : i32
    %c0_i32_1 = arith.constant 0 : i32
    return %arg0, %c0_i32, %c0_i32_0 : i32, i32, i32
  }
}

</mosaic_0001>

<bundles_post_ra>
// kernel: yolo_loss.1
= control target key start
LH: loop header
LB: loop body
LE: loop exit
PB: predicated region body
PF: predicated region fallthrough
CT: control target
= control target key end

     0   :  { %s717_s0 = inlined_call_operand.vmem [shape: f32[30,8,128], index: 0, kind: input, shape index: {}]   ;;  %s718_s1 = inlined_call_operand.vmem [shape: f32[30,8,128], index: 1, kind: input, shape index: {}]   ;;  %s719_s2 = inlined_call_operand.vmem [shape: f32[1,8,128], index: 2, kind: output, shape index: {}]  }
   0x1   :  { %v409_v0 = vld [vmem:[%s717_s0] sm:$0xff]  ;;  %v414_v1 = vld [vmem:[%s717_s0 + $0x8] sm:$0xff]  ;;  %v419_v2 = vld [vmem:[%s717_s0 + $0x10] sm:$0xff] }
   0x2   :  { %v424_v3 = vld [vmem:[%s717_s0 + $0x18] sm:$0xff]  ;;  %v429_v4 = vld [vmem:[%s717_s0 + $0x28] sm:$0xff]  ;;  %v61_v5 = vmul.f32 0.14285715, %v409_v0  ;;  %v63_v6 = vmul.f32 0.5, %v419_v2  ;;  %v441_v8 = vld [vmem:[%s717_s0 + $0x40] sm:$0xff] }
   0x3   :  { %v436_v7 = vld [vmem:[%s717_s0 + $0x38] sm:$0xff]  ;;  %v62_v9 = vmul.f32 0.14285715, %v414_v1  ;;  %v65_v10 = vmul.f32 0.5, %v424_v3  ;;  %v448_v11 = vld [vmem:[%s717_s0 + $0x30] sm:$0xff]  ;;  %v453_v12 = vld [vmem:[%s718_s1] sm:$0xff] }
   0x4   :  { %v458_v13 = vld [vmem:[%s718_s1 + $0x8] sm:$0xff]  ;;  %v64_v14 = vsub.f32 %v61_v5, %v63_v6  ;;  %v67_v15 = vadd.f32 %v63_v6, %v61_v5  ;;  %v86_v16 = vmul.f32 0.14285715, %v429_v4  ;;  %v88_v17 = vmul.f32 0.5, %v436_v7  ;;  %v465_v18 = vld [vmem:[%s718_s1 + $0x10] sm:$0xff]  ;;  %v470_v19 = vld [vmem:[%s718_s1 + $0x18] sm:$0xff] }
   0x5   :  { %v50_v20 = vmul.f32 0.14285715, %v453_v12  ;;  %v66_v21 = vsub.f32 %v62_v9, %v65_v10  ;;  %v68_v22 = vadd.f32 %v65_v10, %v62_v9  ;;  %v51_v23 = vmul.f32 0.14285715, %v458_v13  ;;  %v339_v52 = vld [vmem:[%s717_s0 + $0x50] sm:$0xff]  ;;  %v341_v54 = vld [vmem:[%s717_s0 + $0x58] sm:$0xff] }
   0x6   :  { %v78_v24 = vsub.f32 %v67_v15, %v64_v14  ;;  %v90_v25 = vmul.f32 0.5, %v441_v8  ;;  %v52_v26 = vmul.f32 0.5, %v465_v18  ;;  %v54_v27 = vmul.f32 0.5, %v470_v19  ;;  %v340_v53 = vld [vmem:[%s718_s1 + $0x50] sm:$0xff]  ;;  %v342_v58 = vld [vmem:[%s718_s1 + $0x58] sm:$0xff]  ;;  %v343_v59 = vld [vmem:[%s717_s0 + $0x60] sm:$0xff] }
   0x7   :  { %v79_v28 = vsub.f32 %v68_v22, %v66_v21  ;;  %v87_v29 = vmul.f32 0.14285715, %v448_v11  ;;  %v89_v30 = vsub.f32 %v86_v16, %v88_v17  ;;  %v92_v31 = vadd.f32 %v88_v17, %v86_v16  ;;  %v344_v60 = vld [vmem:[%s718_s1 + $0x60] sm:$0xff]  ;;  %v345_v5 = vld [vmem:[%s717_s0 + $0x68] sm:$0xff]  ;;  %v347_v16 = vld [vmem:[%s717_s0 + $0x70] sm:$0xff] }
   0x8   :  { %v53_v32 = vsub.f32 %v50_v20, %v52_v26  ;;  %v55_v33 = vsub.f32 %v51_v23, %v54_v27  ;;  %v56_v34 = vadd.f32 %v52_v26, %v50_v20  ;;  %v57_v35 = vadd.f32 %v54_v27, %v51_v23  ;;  %v346_v6 = vld [vmem:[%s718_s1 + $0x68] sm:$0xff]  ;;  %v348_v17 = vld [vmem:[%s718_s1 + $0x70] sm:$0xff]  ;;  %v349_v27 = vld [vmem:[%s717_s0 + $0x78] sm:$0xff] }
   0x9   :  { %v80_v36 = vmul.f32 %v79_v28, %v78_v24  ;;  %v91_v37 = vsub.f32 %v87_v29, %v90_v25  ;;  %v93_v38 = vadd.f32 %v90_v25, %v87_v29  ;;  %v103_v39 = vsub.f32 %v92_v31, %v89_v30  ;;  %v350_v28 = vld [vmem:[%s718_s1 + $0x78] sm:$0xff] }
   0xa   :  { %v58_v40 = vsub.f32 %v56_v34, %v53_v32  ;;  %v59_v41 = vsub.f32 %v57_v35, %v55_v33  ;;  %v69_v42 = vmin.f32 %v67_v15, %v56_v34  ;;  %v70_v43 = vmax.f32 %v64_v14, %v53_v32 }
   0xb   :  { %v73_v44 = vmin.f32 %v68_v22, %v57_v35  ;;  %v74_v45 = vmax.f32 %v66_v21, %v55_v33  ;;  %v94_v46 = vmin.f32 %v92_v31, %v56_v34  ;;  %v95_v47 = vmax.f32 %v89_v30, %v53_v32  ;;  %v351_v34 = vld [vmem:[%s717_s0 + $0x80] sm:$0xff] }
   0xc   :  { %v60_v48 = vmul.f32 %v59_v41, %v58_v40  ;;  %v71_v49 = vsub.f32 %v69_v42, %v70_v43  ;;  %v98_v50 = vmin.f32 %v93_v38, %v57_v35  ;;  %v99_v51 = vmax.f32 %v91_v37, %v55_v33  ;;  %v352_v35 = vld [vmem:[%s718_s1 + $0x80] sm:$0xff] }
   0xd   :  { %v75_v55 = vsub.f32 %v73_v44, %v74_v45  ;;  %v96_v56 = vsub.f32 %v94_v46, %v95_v47  ;;  %v104_v57 = vsub.f32 %v93_v38, %v91_v37  ;;  %v174_v15 = vsub.f32 %v339_v52, %v340_v53  ;;  %v353_v45 = vld [vmem:[%s717_s0 + $0x88] sm:$0xff]  ;;  %v355_v52 = vld [vmem:[%s717_s0 + $0x90] sm:$0xff] }
   0xe   :  { %v72_v61 = vmax.f32 %v71_v49, 0.0  ;;  %v81_v62 = vadd.f32 %v80_v36, %v60_v48  ;;  %v100_v63 = vsub.f32 %v98_v50, %v99_v51  ;;  %v180_v21 = vsub.f32 %v341_v54, %v342_v58  ;;  %v354_v46 = vld [vmem:[%s718_s1 + $0x88] sm:$0xff]  ;;  %v356_v53 = vld [vmem:[%s718_s1 + $0x90] sm:$0xff]  ;;  %v357_v58 = vld [vmem:[%s717_s0 + $0x98] sm:$0xff] }
   0xf   :  { %v76_v9 = vmax.f32 %v75_v55, 0.0  ;;  %v97_v10 = vmax.f32 %v96_v56, 0.0  ;;  %v105_v14 = vmul.f32 %v104_v57, %v103_v39  ;;  %v187_v22 = vsub.f32 %v343_v59, %v344_v60  ;;  %v358_v59 = vld [vmem:[%s718_s1 + $0x98] sm:$0xff] }
  0x10   :  { %v101_v20 = vmax.f32 %v100_v63, 0.0  ;;  %v175_v25 = vmul.f32 %v174_v15, %v174_v15  ;;  %v194_v26 = vsub.f32 %v345_v5, %v346_v6  ;;  %v181_v30 = vmul.f32 %v180_v21, %v180_v21  ;;  %v361_v15 = vld [vmem:[%s717_s0 + $0xa8] sm:$0xff] }
  0x11   :  { %v77_v23 = vmul.f32 %v76_v9, %v72_v61  ;;  %v106_v24 = vadd.f32 %v105_v14, %v60_v48  ;;  %v188_v31 = vmul.f32 %v187_v22, %v187_v22  ;;  %v201_v32 = vsub.f32 %v347_v16, %v348_v17  ;;  %v360_v14 = vld [vmem:[%s718_s1 + $0xa0] sm:$0xff]  ;;  %v362_v16 = vld [vmem:[%s718_s1 + $0xa8] sm:$0xff]  ;;  %v336_v17 = vld [vmem:[%s718_s1 + $0x38] sm:$0xff] }
  0x12   :  { %v102_v29 = vmul.f32 %v101_v20, %v97_v10  ;;  %v182_v37 = vadd.f32 %v181_v30, %v175_v25  ;;  %v195_v38 = vmul.f32 %v194_v26, %v194_v26  ;;  %v208_v39 = vsub.f32 %v349_v27, %v350_v28  ;;  %v359_v10 = vld [vmem:[%s717_s0 + $0xa0] sm:$0xff]  ;;  %v363_v25 = vld [vmem:[%s717_s0 + $0xb0] sm:$0xff]  ;;  %v334_v27 = vld [vmem:[%s718_s1 + $0x28] sm:$0xff] }
  0x13   :  { %v82_v33 = vsub.f32 %v81_v62, %v77_v23  ;;  %v202_v43 = vmul.f32 %v201_v32, %v201_v32  ;;  %v215_v44 = vsub.f32 %v351_v34, %v352_v35  ;;  %v222_v51 = vsub.f32 %v353_v45, %v354_v46  ;;  %v364_v26 = vld [vmem:[%s718_s1 + $0xb0] sm:$0xff]  ;;  %v365_v30 = vld [vmem:[%s717_s0 + $0xb8] sm:$0xff]  ;;  %v368_v34 = vld [vmem:[%s718_s1 + $0xc0] sm:$0xff] }
  0x14   :  { %v107_v36 = vsub.f32 %v106_v24, %v102_v29  ;;  %v189_v42 = vadd.f32 %v188_v31, %v182_v37  ;;  %v209_v48 = vmul.f32 %v208_v39, %v208_v39  ;;  %v229_v57 = vsub.f32 %v355_v52, %v356_v53  ;;  %v335_v28 = vld [vmem:[%s718_s1 + $0x30] sm:$0xff]  ;;  %v366_v31 = vld [vmem:[%s718_s1 + $0xb8] sm:$0xff]  ;;  %v369_v35 = vld [vmem:[%s717_s0 + $0xc8] sm:$0xff] }
  0x15   :  { %v83_v40 = vmax.f32 %v82_v33, 1e-12  ;;  %v216_v50 = vmul.f32 %v215_v44, %v215_v44  ;;  %v223_v56 = vmul.f32 %v222_v51, %v222_v51  ;;  %v236_v6 = vsub.f32 %v357_v58, %v358_v59  ;;  %v370_v37 = vld [vmem:[%s718_s1 + $0xc8] sm:$0xff]  ;;  %v372_v39 = vld [vmem:[%s718_s1 + $0xd0] sm:$0xff] }
  0x16   :  { %v108_v41 = vmax.f32 %v107_v36, 1e-12  ;;  %v196_v47 = vadd.f32 %v195_v38, %v189_v42  ;;  %v230_v5 = vmul.f32 %v229_v57, %v229_v57  ;;  %v243_v24 = vsub.f32 %v359_v10, %v360_v14  ;;  %v371_v38 = vld [vmem:[%s717_s0 + $0xd0] sm:$0xff]  ;;  %v373_v42 = vld [vmem:[%s717_s0 + $0xd8] sm:$0xff] }
  0x17   :  { %379 = vrcp.f32 %v83_v40  ;;  %v257_v33 = vsub.f32 %v363_v25, %v364_v26 }
  0x18   :  { %381 = vrcp.f32 %v108_v41  ;;  %v203_v49 = vadd.f32 %v202_v43, %v196_v47  ;;  %v244_v36 = vmul.f32 %v243_v24, %v243_v24  ;;  %v264_v41 = vsub.f32 %v365_v30, %v366_v31  ;;  %v374_v43 = vld [vmem:[%s718_s1 + $0xd8] sm:$0xff] }
  0x19   :  { %v278_v47 = vsub.f32 %v369_v35, %v370_v37  ;;  %v377_v35 = vld [vmem:[%s717_s0 + $0xe8] sm:$0xff] }
  0x1a   :  { %v210_v54 = vadd.f32 %v209_v48, %v203_v49  ;;  %v258_v48 = vmul.f32 %v257_v33, %v257_v33  ;;  %v292_v49 = vsub.f32 %v373_v42, %v374_v43 }
  0x1b   :  { %v279_v57 = vmul.f32 %v278_v47, %v278_v47 }
  0x1c   :  { %v217_v55 = vadd.f32 %v216_v50, %v210_v54  ;;  %v324_v50 = vld [vmem:[%s717_s0 + $0x20] sm:$0xff] }
  0x1e   :  { %v224_v63 = vadd.f32 %v223_v56, %v217_v55  ;;  %v265_v55 = vmul.f32 %v264_v41, %v264_v41 }
  0x20   :  { %v231_v22 = vadd.f32 %v230_v5, %v224_v63  ;;  %v293_v63 = vmul.f32 %v292_v49, %v292_v49 }
  0x21   :  { %v380_v60 = vpop.eup %379 }
  0x22   :  { %v382_v61 = vpop.eup %381  ;;  %v538_v62 = vmul.f32 %v380_v60, %v77_v23  ;;  %v237_v23 = vmul.f32 %v236_v6, %v236_v6 }
  0x23   :  { %v540_v9 = vmul.f32 %v382_v61, %v102_v29 }
  0x25   :  { %vm559_vm0 = vcmp.gt.f32.partialorder %v540_v9, %v538_v62  ;;  %v112_v60 = vmax.f32 %v538_v62, %v540_v9 }
  0x26   :  { %v567_v21 = vsel %vm559_vm0, %v436_v7, %v419_v2  ;;  %v337_v2 = vld [vmem:[%s718_s1 + $0x40] sm:$0xff]  ;;  %v250_v7 = vsub.f32 %v361_v15, %v362_v16  ;;  %v587_v29 = vsel %vm559_vm0, %v336_v17, %v465_v18  ;;  %v599_v32 = vsel %vm559_vm0, %v441_v8, %v424_v3 }
  0x27   :  { %383 = vrsqrt.f32 %v567_v21  ;;  %v367_v18 = vld [vmem:[%s717_s0 + $0xc0] sm:$0xff]  ;;  %v614_v3 = vsel %vm559_vm0, %v337_v2, %v470_v19  ;;  %v238_v8 = vadd.f32 %v237_v23, %v231_v22  ;;  %v113_v19 = vsel %vm559_vm0, %v429_v4, %v409_v0  ;;  %v329_v23 = vld [vmem:[%s717_s0 + $0x48] sm:$0xff] }
  0x28   :  { %385 = vrsqrt.f32 %v587_v29  ;;  %v251_v40 = vmul.f32 %v250_v7, %v250_v7  ;;  %v114_v44 = vsel %vm559_vm0, %v448_v11, %v414_v1  ;;  %v119_v45 = vsel %vm559_vm0, %v334_v27, %v453_v12  ;;  %v650_v4 = vld [vmem:[%s718_s1 + $0x20] sm:$0xff]  ;;  %v338_v2 = vld [vmem:[%s718_s1 + $0x48] sm:$0xff] }
  0x29   :  { %v120_v0 = vsel %vm559_vm0, %v335_v28, %v458_v13  ;;  %387 = vrsqrt.f32 %v599_v32  ;;  %v271_v46 = vsub.f32 %v367_v18, %v368_v34  ;;  %v285_v1 = vsub.f32 %v371_v38, %v372_v39  ;;  %v375_v12 = vld [vmem:[%s717_s0 + $0xe0] sm:$0xff] }
  0x2a   :  { %389 = vrsqrt.f32 %v614_v3  ;;  %v245_v11 = vadd.f32 %v244_v36, %v238_v8  ;;  %v376_v13 = vld [vmem:[%s718_s1 + $0xe0] sm:$0xff]  ;;  %v126_v51 = vsub.f32 %v113_v19, %v119_v45  ;;  %v128_v52 = vsub.f32 %v114_v44, %v120_v0 }
  0x2b   :  { %v165_v53 = vsub.f32 %v324_v50, %v650_v4  ;;  %v272_v56 = vmul.f32 %v271_v46, %v271_v46  ;;  %v286_v58 = vmul.f32 %v285_v1, %v285_v1  ;;  %v299_v59 = vsub.f32 %v375_v12, %v376_v13 }
  0x2c   :  { %v252_v54 = vadd.f32 %v251_v40, %v245_v11  ;;  %vm133_vm1 = vcmp.eq.f32.partialorder %v567_v21, inf  ;;  %v127_v6 = vmul.f32 %v126_v51, %v126_v51  ;;  %v129_v10 = vmul.f32 %v128_v52, %v128_v52 }
  0x2d   :  { %vm135_vm2 = vcmp.eq.f32.partialorder %v567_v21, 0.0  ;;  %v136_v14 = vand.u32 2147483648, %v567_v21  ;;  %vm140_vm3 = vcmp.eq.f32.partialorder %v587_v29, inf  ;;  %v143_v17 = vand.u32 2147483648, %v587_v29 }
  0x2e   :  { %v259_v61 = vadd.f32 %v258_v48, %v252_v54  ;;  %vm142_vm4 = vcmp.eq.f32.partialorder %v587_v29, 0.0  ;;  %vm150_vm5 = vcmp.eq.f32.partialorder %v599_v32, inf  ;;  %vm152_vm6 = vcmp.eq.f32.partialorder %v599_v32, 0.0 }
  0x2f   :  { %v153_v25 = vand.u32 2147483648, %v599_v32  ;;  %vm157_vm7 = vcmp.eq.f32.partialorder %v614_v3, inf  ;;  %v160_v31 = vand.u32 2147483648, %v614_v3  ;;  %vm159_vm8 = vcmp.eq.f32.partialorder %v614_v3, 0.0 }
  0x30   :  { %v266_v22 = vadd.f32 %v265_v55, %v259_v61  ;;  %v130_v8 = vadd.f32 %v129_v10, %v127_v6  ;;  %v167_v19 = vsub.f32 %v329_v23, %v338_v2  ;;  %v118_v41 = vsel %vm559_vm0, %v324_v50, %v329_v23 }
  0x31   :  { %v384_v5 = vpop.eup %383  ;;  %v300_v47 = vmul.f32 %v299_v59, %v299_v59  ;;  %v125_v11 = vmul.f32 %v118_v41, %v118_v41  ;;  %v166_v48 = vmul.f32 %v165_v53, %v165_v53  ;;  %vm49_vm9 = vcmp.gt.f32.partialorder %v650_v4, 0.0 }
  0x32   :  { %v386_v15 = vpop.eup %385  ;;  %v132_v16 = vmul.f32 %v384_v5, %v567_v21  ;;  %v273_v26 = vadd.f32 %v272_v56, %v266_v22  ;;  %v168_v49 = vmul.f32 %v167_v19, %v167_v19 }
  0x33   :  { %v139_v62 = vmul.f32 %v386_v15, %v587_v29  ;;  %v388_v9 = vpop.eup %387  ;;  %v311_v20 = vmul.f32 0.5, %v125_v11 }
  0x34   :  { %v134_v24 = vsel %vm133_vm1, %v567_v21, %v132_v16  ;;  %v390_v27 = vpop.eup %389  ;;  %v149_v30 = vmul.f32 %v388_v9, %v599_v32  ;;  %v280_v34 = vadd.f32 %v279_v57, %v273_v26  ;;  %v378_v21 = vld [vmem:[%s718_s1 + $0xe8] sm:$0xff]  ;;  %v169_v52 = vadd.f32 %v168_v49, %v166_v48 }
  0x35   :  { %v137_v7 = vsel %vm135_vm2, %v136_v14, %v134_v24  ;;  %v141_v28 = vsel %vm140_vm3, %v587_v29, %v139_v62  ;;  %v156_v18 = vmul.f32 %v390_v27, %v614_v3  ;;  %v117_v29 = vsel %vm559_vm0, %v329_v23, %v324_v50 }
  0x36   :  { %v144_v33 = vsel %vm142_vm4, %v143_v17, %v141_v28  ;;  %v151_v37 = vsel %vm150_vm5, %v599_v32, %v149_v30  ;;  %v287_v40 = vadd.f32 %v286_v58, %v280_v34  ;;  %v306_v44 = vsub.f32 %v377_v35, %v378_v21 }
  0x37   :  { %v145_v36 = vsub.f32 %v137_v7, %v144_v33  ;;  %v154_v38 = vsel %vm152_vm6, %v153_v25, %v151_v37  ;;  %v158_v39 = vsel %vm157_vm7, %v614_v3, %v156_v18  ;;  %v123_v45 = vsub.f32 %v117_v29, %v112_v60 }
  0x38   :  { %v161_v43 = vsel %vm159_vm8, %v160_v31, %v158_v39  ;;  %v294_v46 = vadd.f32 %v293_v63, %v287_v40  ;;  %v307_v51 = vmul.f32 %v306_v44, %v306_v44  ;;  %v314_v57 = vmul.f32 0.5, %v169_v52 }
  0x39   :  { %v146_v42 = vmul.f32 %v145_v36, %v145_v36  ;;  %v162_v0 = vsub.f32 %v154_v38, %v161_v43  ;;  %v124_v12 = vmul.f32 %v123_v45, %v123_v45 }
  0x3a   :  { %v301_v3 = vadd.f32 %v300_v47, %v294_v46 }
  0x3b   :  { %v147_v1 = vadd.f32 %v146_v42, %v130_v8  ;;  %v163_v32 = vmul.f32 %v162_v0, %v162_v0 }
  0x3c   :  { %v308_v50 = vadd.f32 %v307_v51, %v301_v3 }
  0x3d   :  { %v164_v13 = vadd.f32 %v163_v32, %v147_v1 }
  0x3f   :  { %v309_v54 = vmul.f32 5.0, %v164_v13 }
  0x41   :  { %v310_v55 = vadd.f32 %v309_v54, %v124_v12 }
  0x43   :  { %v312_v56 = vadd.f32 %v311_v20, %v310_v55 }
  0x45   :  { %v313_v58 = vadd.f32 %v312_v56, %v308_v50 }
  0x47   :  { %v315_v59 = vsel %vm49_vm9, %v313_v58, %v314_v57 }
  0x48   :  { %316 = vst [vmem:[%s719_s2] sm:$0xff] %v315_v59 }

</bundles_post_ra>
